<compile_context>
chip_gen: v7x
topology: tpu7x:2x2x1
jax: 0.10.0
libtpu: 0.0.40
codegen_flags: <defaults>
</compile_context>

<pallas_src>
import jax
import jax.numpy as jnp
from jax import lax
from jax.experimental import pallas as pl
from jax.experimental.pallas import tpu as pltpu

# ---------------- problem sizes (small, consistent with the module) ----------
VOCAB = 50      # word embedding rows
B = 4           # batch
L = 16          # sequence length (num words per text)
E = 32          # word_embedding_dim
F = 32          # num_filters
W = 3           # window_size (odd -> "same" padding)
Q = 16          # query_vector_dim
PAD = (W - 1) // 2
BL = B * L                                   # flattened rows fed to the MXU (64)
KC = ((W * VOCAB + 127) // 128) * 128        # lane-aligned fused contraction dim (256)
NEG_INF = -1e30


def text_encoder_kernel(ids_ref,      # (BL, W)  int32: shifted+offset token ids (-1 = conv zero-pad)
                        mask_ref,     # (B, L, 1) f32 : 1.0 where position < actual length
                        eff_ref,      # (KC, F)  f32 : fused (embedding @ conv-tap) weights
                        conv_b_ref,   # (1, F)
                        att_w_ref,    # (F, Q)
                        att_b_ref,    # (1, Q)
                        att_q_ref,    # (1, Q)
                        out_ref):     # (B, F)
    # ---- fused embedding gather + Conv1d("same", all W taps) as ONE matmul ----
    # multi-hot[p, w*VOCAB + tok(p, w)] = 1 for every in-range window tap.
    # Tap id ranges are disjoint (offset w*VOCAB) and -1 never matches a lane,
    # so a boolean OR of the per-tap one-hots is exact.
    lane = lax.broadcasted_iota(jnp.int32, (BL, KC), 1)
    sel = lane == ids_ref[:, 0:1]
    for w in range(1, W):                                       # W is static & tiny
        sel = sel | (lane == ids_ref[:, w:w + 1])
    oh = sel.astype(jnp.float32)                                # (BL, KC)

    conv = jnp.dot(oh, eff_ref[...], preferred_element_type=jnp.float32)
    conv = conv + conv_b_ref[...]                               # (BL, F)

    # ---- ReLU (dropout is identity in eval mode) ----
    h = jnp.maximum(conv, 0.0)                                  # (BL, F)

    # ---- additive attention: tanh(h @ Wa + ba) . q ----
    proj = jnp.tanh(jnp.dot(h, att_w_ref[...], preferred_element_type=jnp.float32)
                    + att_b_ref[...])                           # (BL, Q)

    # ---- per-row masked softmax: fold back to (B, L, .) ----
    # (sublane-group reshapes only; lane dim is unchanged)
    proj3 = proj.reshape(B, L, Q)
    q_b = att_q_ref[...].reshape(1, 1, Q)
    scores = jnp.sum(proj3 * q_b, axis=-1, keepdims=True)       # (B, L, 1)
    scores = jnp.where(mask_ref[...] > 0.0, scores, NEG_INF)
    m = jnp.max(scores, axis=1, keepdims=True)
    e = jnp.exp(scores - m)
    wts = e * pl.reciprocal(jnp.sum(e, axis=1, keepdims=True), approx=False)  # (B, L, 1)

    # ---- weighted sum over sequence: VPU mul + sublane reduce, one dense store ----
    h3 = h.reshape(B, L, F)
    out_ref[...] = jnp.sum(wts * h3, axis=1).astype(out_ref.dtype)


def text_encoder(text, emb_table, conv_w_t, conv_b, att_w, att_b, att_q):
    """text: (B, L) int32 token ids; returns (B, F) float32 (eval mode)."""
    # ---- tiny integer-side prep (no float activations leave the kernel) ----
    lengths = jnp.sum((text != 0).astype(jnp.int32), axis=1)            # (B,)
    mask = (jnp.arange(L)[None, :] < lengths[:, None]).astype(jnp.float32)
    mask = mask.reshape(B, L, 1)

    # per-tap shifted token ids, offset into the fused table; -1 => conv zero-pad
    cols = []
    for w in range(W):
        d = w - PAD
        pos = jnp.arange(L) + d
        in_rng = (pos >= 0) & (pos < L)
        gathered = text[:, jnp.clip(pos, 0, L - 1)]                     # (B, L)
        shifted = jnp.where(in_rng[None, :], gathered + w * VOCAB, -1)
        cols.append(shifted.reshape(BL))
    ids = jnp.stack(cols, axis=1).astype(jnp.int32)                     # (BL, W)

    # ---- weight prep: fuse the embedding table into each conv window tap ----
    conv_w_k = jnp.transpose(conv_w_t, (2, 1, 0))                       # (W, E, F)
    eff = jnp.einsum('ve,wef->wvf', emb_table, conv_w_k).reshape(W * VOCAB, F)
    eff_pad = jnp.zeros((KC, F), jnp.float32).at[:W * VOCAB].set(eff)
    att_w_k = att_w.T                                                   # (F, Q)

    # Whole batch in one grid step (all blocks == full arrays, so the (8,128)
    # divisibility rule is satisfied trivially).
    return pl.pallas_call(
        text_encoder_kernel,
        out_shape=jax.ShapeDtypeStruct((B, F), jnp.float32),
        grid=(1,),
        in_specs=[
            pl.BlockSpec((BL, W),   lambda i: (0, 0)),
            pl.BlockSpec((B, L, 1), lambda i: (0, 0, 0)),
            pl.BlockSpec((KC, F),   lambda i: (0, 0)),
            pl.BlockSpec((1, F),    lambda i: (0, 0)),
            pl.BlockSpec((F, Q),    lambda i: (0, 0)),
            pl.BlockSpec((1, Q),    lambda i: (0, 0)),
            pl.BlockSpec((1, Q),    lambda i: (0, 0)),
        ],
        out_specs=pl.BlockSpec((B, F), lambda i: (0, 0)),
        compiler_params=pltpu.CompilerParams(
            dimension_semantics=("arbitrary",)),
    )(ids, mask, eff_pad, conv_b.reshape(1, F), att_w_k,
      att_b.reshape(1, Q), att_q.reshape(1, Q))


def text_encoder_ref(text, emb_table, conv_w_t, conv_b, att_w, att_b, att_q):
    """Pure-JAX reference mirroring the PyTorch forward (eval mode)."""
    x = emb_table[text]                                     # (B, L, E)
    x_pad = jnp.pad(x, ((0, 0), (PAD, PAD), (0, 0)))
    conv_w_k = jnp.transpose(conv_w_t, (2, 1, 0))           # (W, E, F)
    conv = conv_b[None, None, :]
    for w in range(W):
        conv = conv + jnp.einsum('ble,ef->blf', x_pad[:, w:w + L, :], conv_w_k[w])
    h = jnp.maximum(conv, 0.0)                              # (B, L, F)
    proj = jnp.tanh(jnp.einsum('blf,qf->blq', h, att_w) + att_b[None, None, :])
    scores = jnp.einsum('blq,q->bl', proj, att_q)           # (B, L)
    lengths = jnp.sum((text != 0).astype(jnp.int32), axis=1)
    mask = jnp.arange(L)[None, :] < lengths[:, None]
    scores = jnp.where(mask, scores, NEG_INF)
    wts = jax.nn.softmax(scores, axis=1)
    return jnp.einsum('bl,blf->bf', wts, h)


if __name__ == "__main__":
    key = jax.random.PRNGKey(0)
    k_emb, k_cw, k_cb, k_aw, k_ab, k_aq, k_txt, k_len = jax.random.split(key, 8)

    # deterministic synthetic parameters (shapes follow the torch module __init__)
    emb_table = jax.random.normal(k_emb, (VOCAB, E), jnp.float32) * 0.1
    emb_table = emb_table.at[0].set(0.0)                    # padding_idx-like row
    conv_w_t = jax.random.normal(k_cw, (F, E, W), jnp.float32) * 0.1   # torch Conv1d weight
    conv_b = jax.random.normal(k_cb, (F,), jnp.float32) * 0.1
    att_w = jax.random.normal(k_aw, (Q, F), jnp.float32) * 0.1         # torch Linear weight
    att_b = jax.random.normal(k_ab, (Q,), jnp.float32) * 0.1
    att_q = jax.random.uniform(k_aq, (Q,), jnp.float32, -0.1, 0.1)

    # token ids with trailing zero padding (so actual_lengths vary per row)
    ids = jax.random.randint(k_txt, (B, L), 1, VOCAB, dtype=jnp.int32)
    lens = jax.random.randint(k_len, (B,), L // 2, L + 1, dtype=jnp.int32)
    text = jnp.where(jnp.arange(L)[None, :] < lens[:, None], ids, 0)

    out = text_encoder(text, emb_table, conv_w_t, conv_b, att_w, att_b, att_q)
    out = jax.block_until_ready(out)

    ref = text_encoder_ref(text, emb_table, conv_w_t, conv_b, att_w, att_b, att_q)
    assert out.shape == (B, F)
    assert jnp.allclose(out, ref, atol=1e-4, rtol=1e-4), "mismatch vs reference"

    print("KERNEL_OK")
</pallas_src>

<mosaic_0001>
module attributes {stable_mosaic.version = 11 : i64} {
  func.func @text_encoder_kernel(%arg0: i32, %arg1: memref<64x3xi32, #tpu.memory_space<vmem>>, %arg2: memref<4x16x1xf32, #tpu.memory_space<vmem>>, %arg3: memref<256x32xf32, #tpu.memory_space<vmem>>, %arg4: memref<1x32xf32, #tpu.memory_space<vmem>>, %arg5: memref<32x16xf32, #tpu.memory_space<vmem>>, %arg6: memref<1x16xf32, #tpu.memory_space<vmem>>, %arg7: memref<1x16xf32, #tpu.memory_space<vmem>>, %arg8: memref<4x32xf32, #tpu.memory_space<vmem>>) attributes {dimension_semantics = [#tpu.dimension_semantics<arbitrary>], iteration_bounds = array<i64: 1>, scalar_prefetch = 0 : i64, scratch_operands = 0 : i64, tpu.core_type = #tpu.core_type<tc>, window_params = [{pipeline_mode = #tpu.pipeline_mode<synchronous>, transform_indices = @transform_0, window_bounds = array<i64: 64, 3>}, {pipeline_mode = #tpu.pipeline_mode<synchronous>, transform_indices = @transform_1, window_bounds = array<i64: 4, 16, 1>}, {pipeline_mode = #tpu.pipeline_mode<synchronous>, transform_indices = @transform_2, window_bounds = array<i64: 256, 32>}, {pipeline_mode = #tpu.pipeline_mode<synchronous>, transform_indices = @transform_3, window_bounds = array<i64: 1, 32>}, {pipeline_mode = #tpu.pipeline_mode<synchronous>, transform_indices = @transform_4, window_bounds = array<i64: 32, 16>}, {pipeline_mode = #tpu.pipeline_mode<synchronous>, transform_indices = @transform_5, window_bounds = array<i64: 1, 16>}, {pipeline_mode = #tpu.pipeline_mode<synchronous>, transform_indices = @transform_6, window_bounds = array<i64: 1, 16>}, {pipeline_mode = #tpu.pipeline_mode<synchronous>, transform_indices = @transform_7, window_bounds = array<i64: 4, 32>}]} {
    %0 = tpu.iota {dimensions = array<i32: 1>} : vector<64x256xi32>
    %c0 = arith.constant 0 : index
    %c0_0 = arith.constant 0 : index
    %1 = vector.load %arg1[%c0, %c0_0] : memref<64x3xi32, #tpu.memory_space<vmem>>, vector<64x1xi32>
    %2 = vector.broadcast %1 : vector<64x1xi32> to vector<64x256xi32>
    %3 = arith.cmpi eq, %0, %2 : vector<64x256xi32>
    %c0_1 = arith.constant 0 : index
    %c1 = arith.constant 1 : index
    %4 = vector.load %arg1[%c0_1, %c1] : memref<64x3xi32, #tpu.memory_space<vmem>>, vector<64x1xi32>
    %5 = vector.broadcast %4 : vector<64x1xi32> to vector<64x256xi32>
    %6 = arith.cmpi eq, %0, %5 : vector<64x256xi32>
    %7 = arith.ori %3, %6 : vector<64x256xi1>
    %c0_2 = arith.constant 0 : index
    %c2 = arith.constant 2 : index
    %8 = vector.load %arg1[%c0_2, %c2] : memref<64x3xi32, #tpu.memory_space<vmem>>, vector<64x1xi32>
    %9 = vector.broadcast %8 : vector<64x1xi32> to vector<64x256xi32>
    %10 = arith.cmpi eq, %0, %9 : vector<64x256xi32>
    %11 = arith.ori %7, %10 : vector<64x256xi1>
    %12 = arith.extui %11 : vector<64x256xi1> to vector<64x256xi32>
    %13 = arith.sitofp %12 : vector<64x256xi32> to vector<64x256xf32>
    %c0_3 = arith.constant 0 : index
    %c0_4 = arith.constant 0 : index
    %14 = vector.load %arg3[%c0_3, %c0_4] : memref<256x32xf32, #tpu.memory_space<vmem>>, vector<256x32xf32>
    %cst = arith.constant dense<0.000000e+00> : vector<64x32xf32>
    %15 = tpu.matmul %13, %14, %cst {dimension_numbers = #tpu.dot_dimension_numbers<[1], [0], [0], [1], [0, 0, 1, 1], [], []>} : vector<64x256xf32>, vector<256x32xf32>, vector<64x32xf32> -> vector<64x32xf32>
    %c0_5 = arith.constant 0 : index
    %c0_6 = arith.constant 0 : index
    %16 = vector.load %arg4[%c0_5, %c0_6] : memref<1x32xf32, #tpu.memory_space<vmem>>, vector<1x32xf32>
    %17 = vector.broadcast %16 : vector<1x32xf32> to vector<64x32xf32>
    %18 = arith.addf %15, %17 : vector<64x32xf32>
    %cst_7 = arith.constant 0.000000e+00 : f32
    %19 = vector.broadcast %cst_7 : f32 to vector<64x32xf32>
    %20 = arith.maximumf %18, %19 : vector<64x32xf32>
    %c0_8 = arith.constant 0 : index
    %c0_9 = arith.constant 0 : index
    %21 = vector.load %arg5[%c0_8, %c0_9] : memref<32x16xf32, #tpu.memory_space<vmem>>, vector<32x16xf32>
    %cst_10 = arith.constant dense<0.000000e+00> : vector<64x16xf32>
    %22 = tpu.matmul %20, %21, %cst_10 {dimension_numbers = #tpu.dot_dimension_numbers<[1], [0], [0], [1], [0, 0, 1, 1], [], []>} : vector<64x32xf32>, vector<32x16xf32>, vector<64x16xf32> -> vector<64x16xf32>
    %c0_11 = arith.constant 0 : index
    %c0_12 = arith.constant 0 : index
    %23 = vector.load %arg6[%c0_11, %c0_12] : memref<1x16xf32, #tpu.memory_space<vmem>>, vector<1x16xf32>
    %24 = vector.broadcast %23 : vector<1x16xf32> to vector<64x16xf32>
    %25 = arith.addf %22, %24 : vector<64x16xf32>
    %26 = math.tanh %25 : vector<64x16xf32>
    %27 = vector.shape_cast %26 : vector<64x16xf32> to vector<4x16x16xf32>
    %c0_13 = arith.constant 0 : index
    %c0_14 = arith.constant 0 : index
    %28 = vector.load %arg7[%c0_13, %c0_14] : memref<1x16xf32, #tpu.memory_space<vmem>>, vector<1x16xf32>
    %29 = vector.shape_cast %28 : vector<1x16xf32> to vector<1x1x16xf32>
    %30 = vector.broadcast %29 : vector<1x1x16xf32> to vector<4x16x16xf32>
    %31 = arith.mulf %27, %30 : vector<4x16x16xf32>
    %cst_15 = arith.constant dense<0.000000e+00> : vector<4x16xf32>
    %32 = vector.multi_reduction <add>, %31, %cst_15 [2] : vector<4x16x16xf32> to vector<4x16xf32>
    %33 = vector.shape_cast %32 : vector<4x16xf32> to vector<4x16x1xf32>
    %c0_16 = arith.constant 0 : index
    %c0_17 = arith.constant 0 : index
    %c0_18 = arith.constant 0 : index
    %34 = vector.load %arg2[%c0_16, %c0_17, %c0_18] : memref<4x16x1xf32, #tpu.memory_space<vmem>>, vector<4x16x1xf32>
    %cst_19 = arith.constant 0.000000e+00 : f32
    %35 = vector.broadcast %cst_19 : f32 to vector<4x16x1xf32>
    %36 = arith.cmpf ogt, %34, %35 : vector<4x16x1xf32>
    %cst_20 = arith.constant -1.000000e+30 : f32
    %37 = vector.broadcast %cst_20 : f32 to vector<4x16x1xf32>
    %38 = arith.select %36, %33, %37 : vector<4x16x1xi1>, vector<4x16x1xf32>
    %cst_21 = arith.constant dense<0xFF800000> : vector<4x1xf32>
    %39 = vector.multi_reduction <maximumf>, %38, %cst_21 [1] : vector<4x16x1xf32> to vector<4x1xf32>
    %40 = vector.shape_cast %39 : vector<4x1xf32> to vector<4x1x1xf32>
    %41 = vector.broadcast %40 : vector<4x1x1xf32> to vector<4x16x1xf32>
    %42 = arith.subf %38, %41 : vector<4x16x1xf32>
    %43 = math.exp %42 : vector<4x16x1xf32>
    %cst_22 = arith.constant dense<0.000000e+00> : vector<4x1xf32>
    %44 = vector.multi_reduction <add>, %43, %cst_22 [1] : vector<4x16x1xf32> to vector<4x1xf32>
    %45 = vector.shape_cast %44 : vector<4x1xf32> to vector<4x1x1xf32>
    %46 = tpu.reciprocal %45 : vector<4x1x1xf32> -> vector<4x1x1xf32>
    %47 = vector.broadcast %46 : vector<4x1x1xf32> to vector<4x16x1xf32>
    %48 = arith.mulf %43, %47 : vector<4x16x1xf32>
    %49 = vector.shape_cast %20 : vector<64x32xf32> to vector<4x16x32xf32>
    %50 = vector.broadcast %48 : vector<4x16x1xf32> to vector<4x16x32xf32>
    %51 = arith.mulf %50, %49 : vector<4x16x32xf32>
    %cst_23 = arith.constant dense<0.000000e+00> : vector<4x32xf32>
    %52 = vector.multi_reduction <add>, %51, %cst_23 [1] : vector<4x16x32xf32> to vector<4x32xf32>
    %c0_24 = arith.constant 0 : index
    %c0_25 = arith.constant 0 : index
    %53 = vector.load %arg8[%c0_24, %c0_25] : memref<4x32xf32, #tpu.memory_space<vmem>>, vector<4x32xf32>
    tpu.vector_store %arg8[%c0_24, %c0_25], %52 {strides = array<i32>} : memref<4x32xf32, #tpu.memory_space<vmem>>, vector<4x32xf32>,
    return
  }
  func.func @transform_0(%arg0: i32) -> (i32, i32) {
    %c0_i32 = arith.constant 0 : i32
    %c0_i32_0 = arith.constant 0 : i32
    %c0_i32_1 = arith.constant 0 : i32
    return %c0_i32, %c0_i32_0 : i32, i32
  }
  func.func @transform_1(%arg0: i32) -> (i32, i32, i32) {
    %c0_i32 = arith.constant 0 : i32
    %c0_i32_0 = arith.constant 0 : i32
    %c0_i32_1 = arith.constant 0 : i32
    %c0_i32_2 = arith.constant 0 : i32
    return %c0_i32, %c0_i32_0, %c0_i32_1 : i32, i32, i32
  }
  func.func @transform_2(%arg0: i32) -> (i32, i32) {
    %c0_i32 = arith.constant 0 : i32
    %c0_i32_0 = arith.constant 0 : i32
    %c0_i32_1 = arith.constant 0 : i32
    return %c0_i32, %c0_i32_0 : i32, i32
  }
  func.func @transform_3(%arg0: i32) -> (i32, i32) {
    %c0_i32 = arith.constant 0 : i32
    %c0_i32_0 = arith.constant 0 : i32
    %c0_i32_1 = arith.constant 0 : i32
    return %c0_i32, %c0_i32_0 : i32, i32
  }
  func.func @transform_4(%arg0: i32) -> (i32, i32) {
    %c0_i32 = arith.constant 0 : i32
    %c0_i32_0 = arith.constant 0 : i32
    %c0_i32_1 = arith.constant 0 : i32
    return %c0_i32, %c0_i32_0 : i32, i32
  }
  func.func @transform_5(%arg0: i32) -> (i32, i32) {
    %c0_i32 = arith.constant 0 : i32
    %c0_i32_0 = arith.constant 0 : i32
    %c0_i32_1 = arith.constant 0 : i32
    return %c0_i32, %c0_i32_0 : i32, i32
  }
  func.func @transform_6(%arg0: i32) -> (i32, i32) {
    %c0_i32 = arith.constant 0 : i32
    %c0_i32_0 = arith.constant 0 : i32
    %c0_i32_1 = arith.constant 0 : i32
    return %c0_i32, %c0_i32_0 : i32, i32
  }
  func.func @transform_7(%arg0: i32) -> (i32, i32) {
    %c0_i32 = arith.constant 0 : i32
    %c0_i32_0 = arith.constant 0 : i32
    %c0_i32_1 = arith.constant 0 : i32
    return %c0_i32, %c0_i32_0 : i32, i32
  }
}

</mosaic_0001>

<bundles_post_ra>
// kernel: tpu_custom_call.1
= control target key start
LH: loop header
LB: loop body
LE: loop exit
PB: predicated region body
PF: predicated region fallthrough
CT: control target
= control target key end

     0   :  { %v1082_v1 = vmov 2   ;;  %v1083_v2 = vmov 0   ;;  %v1084_v22 = vmov 1   ;;  %s1504_s0 = inlined_call_operand.vmem [shape: s32[64,3], index: 0, kind: input, shape index: {}]   ;;  %s1505_s1 = inlined_call_operand.vmem [shape: f32[4,16,1], index: 1, kind: input, shape index: {}]   ;;  %s1506_s2 = inlined_call_operand.vmem [shape: f32[256,32], index: 2, kind: input, shape index: {}]   ;;  %s1507_s3 = inlined_call_operand.vmem [shape: f32[1,32], index: 3, kind: input, shape index: {}]   ;;  %s1508_s4 = inlined_call_operand.vmem [shape: f32[32,16], index: 4, kind: input, shape index: {}]   ;;  %s1509_s5 = inlined_call_operand.vmem [shape: f32[1,16], index: 5, kind: input, shape index: {}]   ;;  %s1510_s6 = inlined_call_operand.vmem [shape: f32[1,16], index: 6, kind: input, shape index: {}]   ;;  %s1511_s7 = inlined_call_operand.hbm [shape: f32[4,32], index: 7, kind: output, shape index: {}]  }
   0x1   :  { %v30_v0 = vld [vmem:[%s1504_s0] sm:$0xff]  ;;  %1000 = vset.pattern.permute.xlu1 %v1082_v1  ;;  %999 = vset.pattern.permute.xlu0 %v1083_v2  ;;  %v239_v4 = vld [vmem:[%s1506_s2 + $0x88] sm:$0xff]  ;;  %v240_v9 = vld [vmem:[%s1506_s2 + $0x90] sm:$0xff] }
   0x2   :  { %135 = vperm.xlu1 %1000, %v30_v0   ;;  %39 = vperm.xlu0 %999, %v30_v0   ;;  %v238_v3 = vld [vmem:[%s1506_s2 + $0x80] sm:$0xff]  ;;  %v223_v6 = vld [vmem:[%s1506_s2 + $0x8] sm:$0xff]  ;;  %v241_v10 = vld [vmem:[%s1506_s2 + $0x98] sm:$0xff] }
   0x3   :  { %v222_v5 = vld [vmem:[%s1506_s2] sm:$0xff]  ;;  %v31_v7 = vld [vmem:[%s1504_s0 + $0x8] sm:$0xff]  ;;  %v938_v8 = vpack.c.bf16 %v239_v4, %v238_v3  ;;  %v942_v12 = vpack.c.bf16 %v241_v10, %v240_v9  ;;  %v224_v13 = vld [vmem:[%s1506_s2 + $0x10] sm:$0xff] }
   0x4   :  { %v940_v11 = vpack.c.bf16 %v223_v6, %v222_v5  ;;  %v225_v14 = vld [vmem:[%s1506_s2 + $0x18] sm:$0xff]  ;;  %v242_v15 = vld [vmem:[%s1506_s2 + $0xa0] sm:$0xff]  ;;  %v243_v16 = vld [vmem:[%s1506_s2 + $0xa8] sm:$0xff] }
   0x5   :  { %v32_v17 = vld [vmem:[%s1504_s0 + $0x10] sm:$0xff]  ;;  %939 = vmatprep.subr.bf16.mxu0 %v938_v8  ;;  %978 = vmatprep.subr.bf16.mxu1 %v938_v8  ;;  %v944_v18 = vpack.c.bf16 %v225_v14, %v224_v13  ;;  %v946_v19 = vpack.c.bf16 %v243_v16, %v242_v15  ;;  %v226_v20 = vld [vmem:[%s1506_s2 + $0x20] sm:$0xff]  ;;  %v227_v21 = vld [vmem:[%s1506_s2 + $0x28] sm:$0xff] }
   0x6   :  { %1001 = vset.pattern.permute.xlu1 %v1083_v2  ;;  %1003 = vset.pattern.permute.xlu0 %v1082_v1  ;;  %v244_v23 = vld [vmem:[%s1506_s2 + $0xb0] sm:$0xff]  ;;  %v245_v24 = vld [vmem:[%s1506_s2 + $0xb8] sm:$0xff] }
   0x7   :  { %42 = vperm.xlu1 %1001, %v31_v7   ;;  %138 = vperm.xlu0 %1003, %v31_v7  }
   0x8   :  { %941 = vmatpush3.bf16.msra.mxu0 %v940_v11  ;;  %986 = vmatpush3.bf16.msra.mxu1 %v940_v11 }
   0x9   :  { %943 = vmatprep.subr.bf16.mxu0 %v942_v12  ;;  %979 = vmatprep.subr.bf16.mxu1 %v942_v12 }
   0xb   :  { %1002 = vset.pattern.permute.xlu1 %v1084_v22  ;;  %141 = vperm.xlu0 %1003, %v32_v17  }
   0xc   :  { %82 = vperm.xlu1 %1002, %v31_v7  }
   0xd   :  { %12 = vsyncpa [#allocation3], 0  ;;  %945 = vmatpush3.bf16.msra.mxu0 %v944_v18  ;;  %v948_v25 = vpack.c.bf16 %v227_v21, %v226_v20  ;;  %987 = vmatpush3.bf16.msra.mxu1 %v944_v18  ;;  %v950_v26 = vpack.c.bf16 %v245_v24, %v244_v23  ;;  %v228_v27 = vld [vmem:[%s1506_s2 + $0x30] sm:$0xff]  ;;  %v229_v28 = vld [vmem:[%s1506_s2 + $0x38] sm:$0xff]  ;;  %v27_v61 = vlaneseq  ;;  %v1085_v8 = vmov 1.0  }
   0xe   :  { %947 = vmatprep.subr.bf16.mxu0 %v946_v19  ;;  %980 = vmatprep.subr.bf16.mxu1 %v946_v19  ;;  %v246_v29 = vld [vmem:[%s1506_s2 + $0xc0] sm:$0xff]  ;;  %v247_v30 = vld [vmem:[%s1506_s2 + $0xc8] sm:$0xff]  ;;  %v33_v31 = vld [vmem:[%s1504_s0 + $0x18] sm:$0xff]  ;;  %v952_v32 = vpack.c.bf16 %v229_v28, %v228_v27 }
   0xf   :  { %1006 = vset.pattern.permute.xlu0 %v1084_v22  ;;  %v954_v33 = vpack.c.bf16 %v247_v30, %v246_v29  ;;  %v230_v34 = vld [vmem:[%s1506_s2 + $0x40] sm:$0xff]  ;;  %v231_v35 = vld [vmem:[%s1506_s2 + $0x48] sm:$0xff]  ;;  %v248_v36 = vld [vmem:[%s1506_s2 + $0xd0] sm:$0xff] }
  0x10   :  { %1004 = vset.pattern.permute.xlu1 %v1083_v2  ;;  %79 = vperm.xlu0 %1006, %v30_v0   ;;  %v249_v37 = vld [vmem:[%s1506_s2 + $0xd8] sm:$0xff]  ;;  %v34_v38 = vld [vmem:[%s1504_s0 + $0x20] sm:$0xff]  ;;  %v956_v39 = vpack.c.bf16 %v231_v35, %v230_v34  ;;  %v232_v41 = vld [vmem:[%s1506_s2 + $0x50] sm:$0xff]  ;;  %v1266_v0 = vand.u32 127, %v27_v61 }
  0x11   :  { %45 = vperm.xlu1 %1004, %v32_v17   ;;  %949 = vmatpush3.bf16.msra.mxu0 %v948_v25  ;;  %v958_v40 = vpack.c.bf16 %v249_v37, %v248_v36  ;;  %v233_v42 = vld [vmem:[%s1506_s2 + $0x58] sm:$0xff]  ;;  %v250_v43 = vld [vmem:[%s1506_s2 + $0xe0] sm:$0xff]  ;;  %v251_v44 = vld [vmem:[%s1506_s2 + $0xe8] sm:$0xff] }
  0x12   :  { %951 = vmatprep.subr.bf16.mxu0 %v950_v26  ;;  %988 = vmatpush3.bf16.msra.mxu1 %v948_v25  ;;  %v36_v45 = vld [vmem:[%s1504_s0 + $0x30] sm:$0xff]  ;;  %v960_v46 = vpack.c.bf16 %v233_v42, %v232_v41  ;;  %v962_v47 = vpack.c.bf16 %v251_v44, %v250_v43  ;;  %v234_v48 = vld [vmem:[%s1506_s2 + $0x60] sm:$0xff]  ;;  %v235_v49 = vld [vmem:[%s1506_s2 + $0x68] sm:$0xff]  ;;  %v1269_v4 = vadd.s32 128, %v1266_v0 }
  0x13   :  { %981 = vmatprep.subr.bf16.mxu1 %v950_v26  ;;  %v252_v50 = vld [vmem:[%s1506_s2 + $0xf0] sm:$0xff]  ;;  %v253_v51 = vld [vmem:[%s1506_s2 + $0xf8] sm:$0xff]  ;;  %v964_v52 = vpack.c.bf16 %v235_v49, %v234_v48  ;;  %v35_v53 = vld [vmem:[%s1504_s0 + $0x28] sm:$0xff] }
  0x14   :  { %88 = vperm.xlu0 %1006, %v33_v31   ;;  %v966_v54 = vpack.c.bf16 %v253_v51, %v252_v50  ;;  %v236_v55 = vld [vmem:[%s1506_s2 + $0x70] sm:$0xff]  ;;  %v237_v56 = vld [vmem:[%s1506_s2 + $0x78] sm:$0xff]  ;;  %v374_v25 = vld [vmem:[%s1508_s4] sm:$0xff] }
  0x15   :  { %1005 = vset.pattern.permute.xlu1 %v1084_v22  ;;  %953 = vmatpush3.bf16.msra.mxu0 %v952_v32  ;;  %v37_v57 = vld [vmem:[%s1504_s0 + $0x38] sm:$0xff]  ;;  %v968_v58 = vpack.c.bf16 %v237_v56, %v236_v55  ;;  %v375_v26 = vld [vmem:[%s1508_s4 + $0x8] sm:$0xff]  ;;  %v376_v28 = vld [vmem:[%s1508_s4 + $0x10] sm:$0xff] }
  0x16   :  { %85 = vperm.xlu1 %1005, %v32_v17   ;;  %955 = vmatprep.subr.bf16.mxu0 %v954_v33  ;;  %v970_v27 = vpack.c.bf16 %v375_v26, %v374_v25  ;;  %v377_v29 = vld [vmem:[%s1508_s4 + $0x18] sm:$0xff] }
  0x17   :  { %989 = vmatpush3.bf16.msra.mxu1 %v952_v32  ;;  %v974_v30 = vpack.c.bf16 %v377_v29, %v376_v28  ;;  %v823_v32 = vld [vmem:[%s1507_s3] ss:$0 sm:$0xff] }
  0x18   :  { %91 = vperm.xlu0 %1006, %v34_v38   ;;  %982 = vmatprep.subr.bf16.mxu1 %v954_v33 }
  0x19   :  { %957 = vmatpush3.bf16.msra.mxu0 %v956_v39 }
  0x1a   :  { %1007 = vset.pattern.permute.xlu1 %v1083_v2  ;;  %959 = vmatprep.subr.bf16.mxu0 %v958_v40 }
  0x1b   :  { %48 = vperm.xlu1 %1007, %v33_v31   ;;  %990 = vmatpush3.bf16.msra.mxu1 %v956_v39 }
  0x1c   :  { %97 = vperm.xlu0 %1006, %v36_v45   ;;  %983 = vmatprep.subr.bf16.mxu1 %v958_v40 }
  0x1d   :  { %961 = vmatpush3.bf16.msra.mxu0 %v960_v46 }
  0x1e   :  { %963 = vmatprep.subr.bf16.mxu0 %v962_v47 }
  0x1f   :  { %1008 = vset.pattern.permute.xlu1 %v1082_v1  ;;  %991 = vmatpush3.bf16.msra.mxu1 %v960_v46 }
  0x20   :  { %144 = vperm.xlu1 %1008, %v33_v31   ;;  %1013 = vset.pattern.permute.xlu0 %v1083_v2 }
  0x21   :  { %54 = vperm.xlu0 %1013, %v35_v53   ;;  %965 = vmatpush3.bf16.msra.mxu0 %v964_v52 }
  0x22   :  { %967 = vmatprep.subr.bf16.mxu0 %v966_v54  ;;  %984 = vmatprep.subr.bf16.mxu1 %v962_v47 }
  0x23   :  { %992 = vmatpush3.bf16.msra.mxu1 %v964_v52 }
  0x24   :  { %1009 = vset.pattern.permute.xlu1 %v1083_v2  ;;  %985 = vmatprep.subr.bf16.mxu1 %v966_v54 }
  0x25   :  { %51 = vperm.xlu1 %1009, %v34_v38   ;;  %60 = vperm.xlu0 %1013, %v37_v57  }
  0x26   :  { %969 = vmatpush3.bf16.msra.mxu0 %v968_v58 }
  0x27   :  { %993 = vmatpush3.bf16.msra.mxu1 %v968_v58 }
  0x28   :  { %971 = vmatprep.subr.bf16.mxu1 %v970_v27 }
  0x29   :  { %1010 = vset.pattern.permute.xlu1 %v1082_v1 }
  0x2a   :  { %147 = vperm.xlu1 %1010, %v34_v38  }
  0x2e   :  { %1011 = vset.pattern.permute.xlu1 %v1083_v2 }
  0x2f   :  { %57 = vperm.xlu1 %1011, %v36_v45  }
  0x33   :  { %1012 = vset.pattern.permute.xlu1 %v1084_v22 }
  0x34   :  { %94 = vperm.xlu1 %1012, %v35_v53  }
  0x38   :  { %1014 = vset.pattern.permute.xlu1 %v1082_v1 }
  0x39   :  { %150 = vperm.xlu1 %1014, %v35_v53  }
  0x3d   :  { %153 = vperm.xlu1 %1014, %v36_v45  }
  0x41   :  { %1015 = vset.pattern.permute.xlu1 %v1084_v22 }
  0x42   :  { %100 = vperm.xlu1 %1015, %v37_v57  }
  0x46   :  { %1016 = vset.pattern.permute.xlu1 %v1082_v1 }
  0x47   :  { %156 = vperm.xlu1 %1016, %v37_v57  }
  0x4b   :  { %1017 = vset.pattern.permute.xlu1 %v1083_v2 }
  0x81   :  { %v136_v59 = vpop.permute.xlu1 %135  ;;  %v40_v60 = vpop.permute.xlu0 %39 }
  0x82   :  { %vm62_vm2 = vcmp.eq.s32.totalorder %v1266_v0, %v40_v60  ;;  %vm63_vm4 = vcmp.eq.s32.totalorder %v1269_v4, %v40_v60  ;;  %vm159_vm13 = vcmp.eq.s32.totalorder %v1269_v4, %v136_v59  ;;  %vm158_vm14 = vcmp.eq.s32.totalorder %v1266_v0, %v136_v59 }
  0x86   :  { %v43_v62 = vpop.permute.xlu1 %42  ;;  %v139_v63 = vpop.permute.xlu0 %138 }
  0x87   :  { %vm64_vm3 = vcmp.eq.s32.totalorder %v1266_v0, %v43_v62  ;;  %vm65_vm5 = vcmp.eq.s32.totalorder %v1269_v4, %v43_v62  ;;  %vm161_vm11 = vcmp.eq.s32.totalorder %v1269_v4, %v139_v63  ;;  %vm160_vm15 = vcmp.eq.s32.totalorder %v1266_v0, %v139_v63 }
  0x8a   :  { %v142_v3 = vpop.permute.xlu0 %141 }
  0x8b   :  { %v83_v5 = vpop.permute.xlu1 %82 }
  0x8c   :  { %vm104_vm0 = vcmp.eq.s32.totalorder %v1266_v0, %v83_v5  ;;  %vm105_vm1 = vcmp.eq.s32.totalorder %v1269_v4, %v83_v5 }
  0x8d   :  { %vm1277_vm6 = vmor %vm64_vm3, %vm104_vm0  ;;  %vm163_vm3 = vcmp.eq.s32.totalorder %v1269_v4, %v142_v3 }
  0x8e   :  { %vm1281_vm7 = vmor %vm65_vm5, %vm105_vm1 }
  0x8f   :  { %v80_v2 = vpop.permute.xlu0 %79 }
  0x90   :  { %vm102_vm8 = vcmp.eq.s32.totalorder %v1266_v0, %v80_v2  ;;  %vm103_vm9 = vcmp.eq.s32.totalorder %v1269_v4, %v80_v2  ;;  %v46_v7 = vpop.permute.xlu1 %45 }
  0x91   :  { %vm118_vm10 = vmor %vm62_vm2, %vm102_vm8 }
  0x92   :  { %vm119_vm12 = vmor %vm63_vm4, %vm103_vm9  ;;  %vm66_vm4 = vcmp.eq.s32.totalorder %v1266_v0, %v46_v7 }
  0x93   :  { %vm175_vm0 = vmor %vm119_vm12, %vm159_vm13  ;;  %v89_v10 = vpop.permute.xlu0 %88 }
  0x94   :  { %824 = vmatprep.mubr.msk.f32.mxu0 %vm175_vm0, %v1085_v8  ;;  %vm174_vm1 = vmor %vm118_vm10, %vm158_vm14  ;;  %vm67_vm10 = vcmp.eq.s32.totalorder %v1269_v4, %v46_v7  ;;  %vm162_vm14 = vcmp.eq.s32.totalorder %v1266_v0, %v142_v3  ;;  %vm108_vm0 = vcmp.eq.s32.totalorder %v1266_v0, %v89_v10 }
  0x95   :  { %825 = vmatmul.mubr.msk.f32.vlgmr.msra.gmra.mrb[0].mxu0 %vm174_vm1, %v1085_v8  ;;  %v86_v9 = vpop.permute.xlu1 %85  ;;  %vm177_vm2 = vmor %vm1281_vm7, %vm161_vm11 }
  0x96   :  { %vm106_vm5 = vcmp.eq.s32.totalorder %v1266_v0, %v86_v9  ;;  %vm107_vm8 = vcmp.eq.s32.totalorder %v1269_v4, %v86_v9  ;;  %826 = vmatprep.mubr.msk.f32.mxu0 %vm177_vm2, %v1085_v8  ;;  %vm176_vm9 = vmor %vm1277_vm6, %vm160_vm15  ;;  %vm109_vm15 = vcmp.eq.s32.totalorder %v1269_v4, %v89_v10 }
  0x97   :  { %vm122_vm12 = vmor %vm66_vm4, %vm106_vm5  ;;  %v92_v13 = vpop.permute.xlu0 %91 }
  0x98   :  { %vm123_vm13 = vmor %vm67_vm10, %vm107_vm8 }
  0x99   :  { %827 = vmatmul.mubr.msk.f32.gmra.mrb[2].mxu0 %vm176_vm9, %v1085_v8  ;;  %vm179_vm7 = vmor %vm123_vm13, %vm163_vm3 }
  0x9a   :  { %828 = vmatprep.mubr.msk.f32.mxu0 %vm179_vm7, %v1085_v8  ;;  %v49_v11 = vpop.permute.xlu1 %48  ;;  %vm178_vm1 = vmor %vm122_vm12, %vm162_vm14  ;;  %vm110_vm12 = vcmp.eq.s32.totalorder %v1266_v0, %v92_v13  ;;  %vm111_vm14 = vcmp.eq.s32.totalorder %v1269_v4, %v92_v13 }
  0x9b   :  { %vm68_vm11 = vcmp.eq.s32.totalorder %v1266_v0, %v49_v11  ;;  %vm69_vm6 = vcmp.eq.s32.totalorder %v1269_v4, %v49_v11  ;;  %v98_v16 = vpop.permute.xlu0 %97 }
  0x9c   :  { %vm124_vm2 = vmor %vm68_vm11, %vm108_vm0 }
  0x9d   :  { %829 = vmatmul.mubr.msk.f32.gmra.mrb[4].mxu0 %vm178_vm1, %v1085_v8  ;;  %vm125_vm4 = vmor %vm69_vm6, %vm109_vm15 }
  0x9f   :  { %v145_v12 = vpop.permute.xlu1 %144 }
  0xa0   :  { %vm164_vm3 = vcmp.eq.s32.totalorder %v1266_v0, %v145_v12  ;;  %vm165_vm5 = vcmp.eq.s32.totalorder %v1269_v4, %v145_v12  ;;  %v55_v18 = vpop.permute.xlu0 %54 }
  0xa1   :  { %vm180_vm8 = vmor %vm124_vm2, %vm164_vm3 }
  0xa2   :  { %vm181_vm9 = vmor %vm125_vm4, %vm165_vm5  ;;  %vm72_vm4 = vcmp.eq.s32.totalorder %v1266_v0, %v55_v18  ;;  %vm73_vm5 = vcmp.eq.s32.totalorder %v1269_v4, %v55_v18 }
  0xa3   :  { %830 = vmatprep.mubr.msk.f32.mxu0 %vm181_vm9, %v1085_v8 }
  0xa4   :  { %831 = vmatmul.mubr.msk.f32.gmra.mrb[6].mxu0 %vm180_vm8, %v1085_v8  ;;  %v52_v14 = vpop.permute.xlu1 %51  ;;  %v61_v22 = vpop.permute.xlu0 %60 }
  0xa5   :  { %vm70_vm10 = vcmp.eq.s32.totalorder %v1266_v0, %v52_v14  ;;  %vm71_vm13 = vcmp.eq.s32.totalorder %v1269_v4, %v52_v14  ;;  %v849_v14 = vld [vmem:[%s1510_s6] ss:$0 sm:$0xff] }
  0xa6   :  { %vm126_vm7 = vmor %vm70_vm10, %vm110_vm12 }
  0xa7   :  { %vm127_vm11 = vmor %vm71_vm13, %vm111_vm14 }
  0xa9   :  { %v148_v15 = vpop.permute.xlu1 %147 }
  0xaa   :  { %vm166_vm0 = vcmp.eq.s32.totalorder %v1266_v0, %v148_v15  ;;  %vm167_vm1 = vcmp.eq.s32.totalorder %v1269_v4, %v148_v15 }
  0xab   :  { %vm182_vm6 = vmor %vm126_vm7, %vm166_vm0 }
  0xac   :  { %vm183_vm15 = vmor %vm127_vm11, %vm167_vm1  ;;  %vm114_vm11 = vcmp.eq.s32.totalorder %v1266_v0, %v98_v16  ;;  %vm115_vm1 = vcmp.eq.s32.totalorder %v1269_v4, %v98_v16 }
  0xad   :  { %832 = vmatprep.mubr.msk.f32.mxu0 %vm183_vm15, %v1085_v8 }
  0xae   :  { %833 = vmatmul.mubr.msk.f32.gmra.mrb[8].mxu0 %vm182_vm6, %v1085_v8  ;;  %v58_v17 = vpop.permute.xlu1 %57 }
  0xaf   :  { %vm74_vm9 = vcmp.eq.s32.totalorder %v1266_v0, %v58_v17  ;;  %vm75_vm14 = vcmp.eq.s32.totalorder %v1269_v4, %v58_v17 }
  0xb0   :  { %vm130_vm6 = vmor %vm74_vm9, %vm114_vm11  ;;  %vm76_vm9 = vcmp.eq.s32.totalorder %v1266_v0, %v61_v22 }
  0xb3   :  { %v95_v19 = vpop.permute.xlu1 %94 }
  0xb4   :  { %vm112_vm2 = vcmp.eq.s32.totalorder %v1266_v0, %v95_v19  ;;  %vm113_vm3 = vcmp.eq.s32.totalorder %v1269_v4, %v95_v19 }
  0xb5   :  { %vm128_vm8 = vmor %vm72_vm4, %vm112_vm2 }
  0xb6   :  { %vm129_vm10 = vmor %vm73_vm5, %vm113_vm3 }
  0xb7   :  { %vm131_vm2 = vmor %vm75_vm14, %vm115_vm1 }
  0xb8   :  { %v151_v20 = vpop.permute.xlu1 %150 }
  0xb9   :  { %vm168_vm12 = vcmp.eq.s32.totalorder %v1266_v0, %v151_v20  ;;  %vm169_vm13 = vcmp.eq.s32.totalorder %v1269_v4, %v151_v20 }
  0xba   :  { %vm184_vm7 = vmor %vm128_vm8, %vm168_vm12  ;;  %vm77_vm12 = vcmp.eq.s32.totalorder %v1269_v4, %v61_v22 }
  0xbb   :  { %vm185_vm0 = vmor %vm129_vm10, %vm169_vm13 }
  0xbc   :  { %834 = vmatprep.mubr.msk.f32.mxu0 %vm185_vm0, %v1085_v8  ;;  %v154_v21 = vpop.permute.xlu1 %153 }
  0xbd   :  { %vm170_vm15 = vcmp.eq.s32.totalorder %v1266_v0, %v154_v21  ;;  %835 = vmatmul.mubr.msk.f32.gmra.mrb[10].mxu0 %vm184_vm7, %v1085_v8  ;;  %vm171_vm4 = vcmp.eq.s32.totalorder %v1269_v4, %v154_v21 }
  0xbe   :  { %vm186_vm3 = vmor %vm130_vm6, %vm170_vm15  ;;  %vm385_vm6 = vcmask 261120   ;;  %vm538_vm15 = vcmask 130048  }
  0xbf   :  { %vm187_vm5 = vmor %vm131_vm2, %vm171_vm4  ;;  %vm587_vm4 = vcmask 7168  }
  0xc0   :  { %836 = vmatprep.mubr.msk.f32.mxu1 %vm187_vm5, %v1085_v8 }
  0xc1   :  { %837 = vmatmul.mubr.msk.f32.vlgmr.msra.gmra.mrb[0].mxu1 %vm186_vm3, %v1085_v8  ;;  %v101_v23 = vpop.permute.xlu1 %100 }
  0xc2   :  { %vm116_vm8 = vcmp.eq.s32.totalorder %v1266_v0, %v101_v23  ;;  %vm117_vm10 = vcmp.eq.s32.totalorder %v1269_v4, %v101_v23  ;;  %973 = vmatpush3.bf16.msra.mxu1 %v970_v27 }
  0xc3   :  { %vm132_vm13 = vmor %vm76_vm9, %vm116_vm8  ;;  %975 = vmatprep.subr.bf16.mxu1 %v974_v30 }
  0xc4   :  { %vm133_vm14 = vmor %vm77_vm12, %vm117_vm10 }
  0xc6   :  { %v157_v24 = vpop.permute.xlu1 %156  ;;  %977 = vmatpush3.bf16.msra.mxu1 %v974_v30 }
  0xc7   :  { %vm172_vm7 = vcmp.eq.s32.totalorder %v1266_v0, %v157_v24  ;;  %vm173_vm11 = vcmp.eq.s32.totalorder %v1269_v4, %v157_v24 }
  0xc8   :  { %vm188_vm0 = vmor %vm132_vm13, %vm172_vm7  ;;  %vm786_vm7 = vcmask 1042434  }
  0xc9   :  { %vm189_vm1 = vmor %vm133_vm14, %vm173_vm11  ;;  %vm784_vm14 = vcmask 1041409   ;;  %vm788_vm11 = vcmask 1043459  }
  0xca   :  { %838 = vmatprep.mubr.msk.f32.mxu1 %vm189_vm1, %v1085_v8 }
  0xcb   :  { %839 = vmatmul.mubr.msk.f32.gmra.mrb[2].mxu1 %vm188_vm0, %v1085_v8  ;;  %v840_v8 = vld [vmem:[%s1509_s5] ss:$0 sm:$0xff]  ;;  %vm791_vm0 = vcmask 257024  }
 0x168   :  { %v882_v31 = vpop.f32.mrb[0].mxu0 }
 0x169   :  { %v883_v33 = vpop.f32.mrb[1].mxu0 }
 0x16a   :  { %v884_v34 = vadd.f32 %v883_v33, %v882_v31 }
 0x16c   :  { %v1362_v35 = vadd.f32 %v884_v34, %v823_v32  ;;  %v885_v36 = vpop.f32.mrb[2].mxu0 }
 0x16d   :  { %v886_v37 = vpop.f32.mrb[3].mxu0 }
 0x16e   :  { %v366_v38 = vmax.f32 %v1362_v35, 0.0  ;;  %v887_v39 = vadd.f32 %v886_v37, %v885_v36 }
 0x170   :  { %v1365_v40 = vadd.f32 %v887_v39, %v823_v32  ;;  %v888_v41 = vpop.f32.mrb[4].mxu0  ;;  %926 = vmatprep.mubr.msk.f32.mxu1 %vm385_vm6, %v366_v38 }
 0x171   :  { %v889_v42 = vpop.f32.mrb[5].mxu0 }
 0x172   :  { %v367_v43 = vmax.f32 %v1365_v40, 0.0  ;;  %v890_v44 = vadd.f32 %v889_v42, %v888_v41 }
 0x174   :  { %v1371_v45 = vadd.f32 %v890_v44, %v823_v32  ;;  %927 = vmatmul.mubr.msk.f32.vlgmr.msra.gmra.mrb[4].mxu1 %vm385_vm6, %v367_v43 }
 0x176   :  { %v368_v46 = vmax.f32 %v1371_v45, 0.0 }
 0x177   :  { %v891_v47 = vpop.f32.mrb[6].mxu0 }
 0x178   :  { %v892_v48 = vpop.f32.mrb[7].mxu0  ;;  %929 = vmatprep.mubr.msk.f32.mxu1 %vm385_vm6, %v368_v46 }
 0x179   :  { %v893_v49 = vadd.f32 %v892_v48, %v891_v47 }
 0x17b   :  { %v1380_v50 = vadd.f32 %v893_v49, %v823_v32 }
 0x17d   :  { %v369_v51 = vmax.f32 %v1380_v50, 0.0 }
 0x17f   :  { %930 = vmatmul.mubr.msk.f32.gmra.mrb[6].mxu1 %vm385_vm6, %v369_v51 }
 0x181   :  { %v894_v52 = vpop.f32.mrb[8].mxu0 }
 0x182   :  { %v895_v53 = vpop.f32.mrb[9].mxu0 }
 0x183   :  { %v896_v54 = vadd.f32 %v895_v53, %v894_v52 }
 0x185   :  { %v1386_v55 = vadd.f32 %v896_v54, %v823_v32 }
 0x187   :  { %v370_v56 = vmax.f32 %v1386_v55, 0.0 }
 0x189   :  { %932 = vmatprep.mubr.msk.f32.mxu1 %vm385_vm6, %v370_v56 }
 0x190   :  { %v897_v57 = vpop.f32.mrb[10].mxu0 }
 0x191   :  { %v898_v58 = vpop.f32.mrb[11].mxu0 }
 0x192   :  { %v899_v59 = vadd.f32 %v898_v58, %v897_v57 }
 0x194   :  { %v1392_v60 = vadd.f32 %v899_v59, %v823_v32  ;;  %v900_v61 = vpop.f32.mrb[0].mxu1 }
 0x195   :  { %v901_v62 = vpop.f32.mrb[1].mxu1 }
 0x196   :  { %v371_v63 = vmax.f32 %v1392_v60, 0.0  ;;  %v902_v0 = vadd.f32 %v901_v62, %v900_v61  ;;  %v564_v61 = vld [vmem:[%s1505_s1 + $0x8] sm:$0xff]  ;;  %v563_v62 = vld [vmem:[%s1505_s1] sm:$0xff] }
 0x197   :  { %vm572_vm2 = vcmp.gt.f32.partialorder %v564_v61, 0.0  ;;  %vm571_vm3 = vcmp.gt.f32.partialorder %v563_v62, 0.0 }
 0x198   :  { %v1395_v3 = vadd.f32 %v902_v0, %v823_v32  ;;  %933 = vmatmul.mubr.msk.f32.gmra.mrb[8].mxu1 %vm385_vm6, %v371_v63 }
 0x19a   :  { %v372_v4 = vmax.f32 %v1395_v3, 0.0 }
 0x19c   :  { %935 = vmatprep.mubr.msk.f32.mxu1 %vm385_vm6, %v372_v4 }
 0x19e   :  { %v903_v5 = vpop.f32.mrb[2].mxu1 }
 0x19f   :  { %v904_v1 = vpop.f32.mrb[3].mxu1 }
 0x1a0   :  { %v905_v2 = vadd.f32 %v904_v1, %v903_v5 }
 0x1a2   :  { %v1404_v6 = vadd.f32 %v905_v2, %v823_v32 }
 0x1a4   :  { %v373_v7 = vmax.f32 %v1404_v6, 0.0 }
 0x1a6   :  { %936 = vmatmul.mubr.msk.f32.gmra.mrb[10].mxu1 %vm385_vm6, %v373_v7 }
 0x247   :  { %v928_v9 = vpop.f32.mrb[4].mxu1 }
 0x248   :  { %v482_v10 = vadd.f32 %v928_v9, %v840_v8  ;;  %v476_v11 = vpop.f32.mrb[5].mxu1 }
 0x249   :  { %v477_v12 = vadd.f32 %v840_v8, %v476_v11 }
 0x24a   :  { %1018 = vtanh.f32 %v482_v10 }
 0x24b   :  { %1020 = vtanh.f32 %v477_v12 }
 0x252   :  { %v931_v13 = vpop.f32.mrb[6].mxu1 }
 0x253   :  { %v492_v15 = vadd.f32 %v931_v13, %v840_v8  ;;  %v486_v16 = vpop.f32.mrb[7].mxu1  ;;  %v566_v13 = vld [vmem:[%s1505_s1 + $0x18] sm:$0xff] }
 0x254   :  { %v1019_v17 = vpop.eup %1018  ;;  %v487_v18 = vadd.f32 %v840_v8, %v486_v16  ;;  %vm574_vm5 = vcmp.gt.f32.partialorder %v566_v13, 0.0 }
 0x255   :  { %v1021_v19 = vpop.eup %1020  ;;  %1022 = vtanh.f32 %v492_v15  ;;  %v531_v20 = vmul.f32 %v1019_v17, %v849_v14  ;;  %v565_v15 = vld [vmem:[%s1505_s1 + $0x10] sm:$0xff] }
 0x256   :  { %1024 = vtanh.f32 %v487_v18  ;;  %v530_v21 = vmul.f32 %v1021_v19, %v849_v14  ;;  %vm573_vm8 = vcmp.gt.f32.partialorder %v565_v15, 0.0 }
 0x257   :  { %v542_v22 = vsel %vm538_vm15, %v531_v20, 0.0 }
 0x258   :  { %543 = vadd.xlane.f32.xlu1 %v542_v22  ;;  %v539_v23 = vsel %vm538_vm15, %v530_v21, 0.0 }
 0x259   :  { %540 = vadd.xlane.f32.xlu0 %v539_v23 }
 0x25f   :  { %v1023_v24 = vpop.eup %1022 }
 0x260   :  { %v1025_v25 = vpop.eup %1024  ;;  %v533_v26 = vmul.f32 %v1023_v24, %v849_v14 }
 0x261   :  { %v532_v28 = vmul.f32 %v1025_v25, %v849_v14 }
 0x262   :  { %v548_v27 = vsel %vm538_vm15, %v533_v26, 0.0 }
 0x263   :  { %549 = vadd.xlane.f32.xlu0 %v548_v27  ;;  %v545_v29 = vsel %vm538_vm15, %v532_v28, 0.0 }
 0x267   :  { %546 = vadd.xlane.f32.xlu0 %v545_v29 }
 0x26b   :  { %v934_v30 = vpop.f32.mrb[8].mxu1 }
 0x26c   :  { %v502_v31 = vadd.f32 %v934_v30, %v840_v8  ;;  %v496_v32 = vpop.f32.mrb[9].mxu1 }
 0x26d   :  { %v497_v33 = vadd.f32 %v840_v8, %v496_v32 }
 0x26e   :  { %1026 = vtanh.f32 %v502_v31 }
 0x26f   :  { %1028 = vtanh.f32 %v497_v33 }
 0x278   :  { %v1027_v34 = vpop.eup %1026 }
 0x279   :  { %v1029_v36 = vpop.eup %1028  ;;  %v937_v37 = vpop.f32.mrb[10].mxu1  ;;  %v535_v39 = vmul.f32 %v1027_v34, %v849_v14 }
 0x27a   :  { %v512_v41 = vadd.f32 %v937_v37, %v840_v8  ;;  %v506_v42 = vpop.f32.mrb[11].mxu1  ;;  %v534_v44 = vmul.f32 %v1029_v36, %v849_v14  ;;  %v568_v37 = vld [vmem:[%s1505_s1 + $0x28] sm:$0xff] }
 0x27b   :  { %v507_v47 = vadd.f32 %v840_v8, %v506_v42  ;;  %v554_v48 = vsel %vm538_vm15, %v535_v39, 0.0  ;;  %vm576_vm9 = vcmp.gt.f32.partialorder %v568_v37, 0.0 }
 0x27c   :  { %1030 = vtanh.f32 %v512_v41  ;;  %555 = vadd.xlane.f32.xlu0 %v554_v48  ;;  %v551_v49 = vsel %vm538_vm15, %v534_v44, 0.0  ;;  %v567_v44 = vld [vmem:[%s1505_s1 + $0x20] sm:$0xff] }
 0x27d   :  { %1032 = vtanh.f32 %v507_v47  ;;  %552 = vadd.xlane.f32.xlu1 %v551_v49  ;;  %vm575_vm10 = vcmp.gt.f32.partialorder %v567_v44, 0.0 }
 0x286   :  { %v1031_v52 = vpop.eup %1030 }
 0x287   :  { %v1033_v53 = vpop.eup %1032  ;;  %v537_v54 = vmul.f32 %v1031_v52, %v849_v14 }
 0x288   :  { %v536_v57 = vmul.f32 %v1033_v53, %v849_v14 }
 0x289   :  { %v560_v58 = vsel %vm538_vm15, %v537_v54, 0.0 }
 0x28a   :  { %561 = vadd.xlane.f32.xlu0 %v560_v58  ;;  %v557_v59 = vsel %vm538_vm15, %v536_v57, 0.0 }
 0x28b   :  { %558 = vadd.xlane.f32.xlu1 %v557_v59 }
 0x2e5   :  { %v544_v0 = vpop.xlane.xlu1 %543 }
 0x2e6   :  { %v580_v5 = vsel %vm572_vm2, %v544_v0, -1e+30  ;;  %v541_v1 = vpop.xlane.xlu0 %540 }
 0x2e7   :  { %v589_v2 = vsel %vm587_vm4, %v580_v5, -inf  ;;  %v579_v8 = vsel %vm571_vm3, %v541_v1, -1e+30 }
 0x2e8   :  { %v588_v9 = vsel %vm587_vm4, %v579_v8, -inf }
 0x2e9   :  { %v590_v10 = vmax.f32 %v588_v9, %v589_v2 }
 0x2eb   :  { %v591_v11 = vrot.slane %v590_v10, 4 }
 0x2ed   :  { %v592_v12 = vmax.f32 %v590_v10, %v591_v11 }
 0x2ef   :  { %v593_v14 = vrot.slane %v592_v12, 2 }
 0x2f0   :  { %v550_v16 = vpop.xlane.xlu0 %549 }
 0x2f1   :  { %v594_v17 = vmax.f32 %v592_v12, %v593_v14  ;;  %v582_v19 = vsel %vm574_vm5, %v550_v16, -1e+30  ;;  %v570_v12 = vld [vmem:[%s1505_s1 + $0x38] sm:$0xff]  ;;  %v569_v16 = vld [vmem:[%s1505_s1 + $0x30] sm:$0xff]  ;;  %s1086_s1 = smov [#allocation2]  }
 0x2f2   :  { %v598_v23 = vsel %vm587_vm4, %v582_v19, -inf  ;;  %vm578_vm12 = vcmp.gt.f32.partialorder %v570_v12, 0.0  ;;  %vm577_vm13 = vcmp.gt.f32.partialorder %v569_v16, 0.0  ;;  %s799_s2 = sshll.u32 %s1086_s1, 4  ;;  %s800_s2 = int_to_ptr.vmem [resolvable:$true] %s799_s2 }
 0x2f3   :  { %v595_v18 = vrot.slane %v594_v17, 1  ;;  %s1058_s12 = scalar_lea.vmem %s800_s2, 64  ;;  %p1063_p1 = scmp.lt.s32.totalorder %s800_s2, %s800_s2 }
 0x2f4   :  { %v547_v20 = vpop.xlane.xlu0 %546  ;;  %p1059_p0 = scmp.ne.s32.totalorder %s800_s2, %s1058_s12  ;;  %p1064_p2 = scmp.lt.s32.totalorder %s1058_s12, %s1058_s12 }
 0x2f5   :  { %v596_v21 = vmax.f32 %v594_v17, %v595_v18  ;;  %v581_v22 = vsel %vm573_vm8, %v547_v20, -1e+30 }
 0x2f6   :  { %v597_v24 = vsel %vm587_vm4, %v581_v22, -inf  ;;  %p1065_p3 = por %p1064_p2, %p1063_p1 }
 0x2f7   :  { %v624_v25 = vsub.f32 %v579_v8, %v596_v21  ;;  %v625_v26 = vsub.f32 %v580_v5, %v596_v21  ;;  %v599_v27 = vmax.f32 %v597_v24, %v598_v23 }
 0x2f8   :  { %p1066_p4 = pnand %p1065_p3, %p1059_p0 }
 0x2f9   :  { %v632_v28 = vmul.f32 1.442695, %v624_v25  ;;  %v634_v29 = vmul.f32 1.442695, %v625_v26  ;;  %v600_v30 = vrot.slane %v599_v27, 4 }
 0x2fb   :  { %1034 = vpow2.f32 %v632_v28  ;;  %v601_v31 = vmax.f32 %v599_v27, %v600_v30 }
 0x2fc   :  { %1036 = vpow2.f32 %v634_v29 }
 0x2fd   :  { %v602_v32 = vrot.slane %v601_v31, 2 }
 0x2ff   :  { %v603_v33 = vmax.f32 %v601_v31, %v602_v32 }
 0x301   :  { %v604_v34 = vrot.slane %v603_v33, 1 }
 0x303   :  { %v605_v36 = vmax.f32 %v603_v33, %v604_v34 }
 0x305   :  { %v1443_v39 = vpop.eup %1034  ;;  %v626_v41 = vsub.f32 %v581_v22, %v605_v36  ;;  %v627_v42 = vsub.f32 %v582_v19, %v605_v36 }
 0x306   :  { %v1037_v47 = vpop.eup %1036  ;;  %v648_v48 = vsel %vm587_vm4, %v1443_v39, 0.0 }
 0x307   :  { %v649_v49 = vsel %vm587_vm4, %v1037_v47, 0.0  ;;  %v636_v52 = vmul.f32 1.442695, %v626_v41  ;;  %v638_v53 = vmul.f32 1.442695, %v627_v42 }
 0x308   :  { %v650_v54 = vadd.f32 %v649_v49, %v648_v48 }
 0x309   :  { %1038 = vpow2.f32 %v636_v52  ;;  %v556_v57 = vpop.xlane.xlu0 %555 }
 0x30a   :  { %v651_v58 = vrot.slane %v650_v54, 4  ;;  %1040 = vpow2.f32 %v638_v53  ;;  %v584_v59 = vsel %vm576_vm9, %v556_v57, -1e+30  ;;  %v553_v61 = vpop.xlane.xlu1 %552 }
 0x30b   :  { %v607_v62 = vsel %vm587_vm4, %v584_v59, -inf  ;;  %v583_v0 = vsel %vm575_vm10, %v553_v61, -1e+30 }
 0x30c   :  { %v652_v5 = vadd.f32 %v651_v58, %v650_v54  ;;  %v606_v1 = vsel %vm587_vm4, %v583_v0, -inf }
 0x30d   :  { %v608_v2 = vmax.f32 %v606_v1, %v607_v62 }
 0x30e   :  { %v653_v8 = vrot.slane %v652_v5, 2 }
 0x30f   :  { %v609_v9 = vrot.slane %v608_v2, 4 }
 0x310   :  { %v654_v10 = vadd.f32 %v653_v8, %v652_v5 }
 0x311   :  { %v610_v11 = vmax.f32 %v608_v2, %v609_v9 }
 0x312   :  { %v655_v13 = vrot.slane %v654_v10, 1 }
 0x313   :  { %v1039_v14 = vpop.eup %1038  ;;  %v611_v15 = vrot.slane %v610_v11, 2 }
 0x314   :  { %v1041_v17 = vpop.eup %1040  ;;  %v657_v18 = vsel %vm587_vm4, %v1039_v14, 0.0  ;;  %v656_v19 = vadd.f32 %v655_v13, %v654_v10 }
 0x315   :  { %v658_v20 = vsel %vm587_vm4, %v1041_v17, 0.0  ;;  %v612_v21 = vmax.f32 %v610_v11, %v611_v15 }
 0x316   :  { %v659_v22 = vadd.f32 %v658_v20, %v657_v18  ;;  %1042 = vrcp.f32 %v656_v19 }
 0x317   :  { %v613_v23 = vrot.slane %v612_v21, 1  ;;  %v562_v24 = vpop.xlane.xlu0 %561 }
 0x318   :  { %v660_v25 = vrot.slane %v659_v22, 4  ;;  %v586_v26 = vsel %vm578_vm12, %v562_v24, -1e+30  ;;  %v559_v27 = vpop.xlane.xlu1 %558 }
 0x319   :  { %v614_v28 = vmax.f32 %v612_v21, %v613_v23  ;;  %v616_v29 = vsel %vm587_vm4, %v586_v26, -inf  ;;  %v585_v30 = vsel %vm577_vm13, %v559_v27, -1e+30 }
 0x31a   :  { %v661_v31 = vadd.f32 %v660_v25, %v659_v22  ;;  %v615_v32 = vsel %vm587_vm4, %v585_v30, -inf }
 0x31b   :  { %v628_v33 = vsub.f32 %v583_v0, %v614_v28  ;;  %v629_v34 = vsub.f32 %v584_v59, %v614_v28  ;;  %v617_v36 = vmax.f32 %v615_v32, %v616_v29 }
 0x31c   :  { %v662_v37 = vrot.slane %v661_v31, 2 }
 0x31d   :  { %v640_v41 = vmul.f32 1.442695, %v628_v33  ;;  %v642_v42 = vmul.f32 1.442695, %v629_v34  ;;  %v618_v44 = vrot.slane %v617_v36, 4 }
 0x31e   :  { %v663_v48 = vadd.f32 %v662_v37, %v661_v31 }
 0x31f   :  { %1044 = vpow2.f32 %v640_v41  ;;  %v619_v49 = vmax.f32 %v617_v36, %v618_v44 }
 0x320   :  { %v1043_v52 = vpop.eup %1042  ;;  %1046 = vpow2.f32 %v642_v42  ;;  %v664_v53 = vrot.slane %v663_v48, 1 }
 0x321   :  { %v620_v54 = vrot.slane %v619_v49, 2  ;;  %v689_v57 = vmul.f32 %v1043_v52, %v1037_v47  ;;  %v688_v58 = vmul.f32 %v1043_v52, %v1443_v39 }
 0x322   :  { %v665_v61 = vadd.f32 %v664_v53, %v663_v48 }
 0x323   :  { %v621_v62 = vmax.f32 %v619_v49, %v620_v54  ;;  %703 = vperm.xlu0 %1013, %v689_v57   ;;  %698 = vperm.xlu1 %1017, %v688_v58  }
 0x324   :  { %1048 = vrcp.f32 %v665_v61 }
 0x325   :  { %v622_v59 = vrot.slane %v621_v62, 1 }
 0x327   :  { %v623_v0 = vmax.f32 %v621_v62, %v622_v59 }
 0x329   :  { %v1045_v5 = vpop.eup %1044  ;;  %v630_v1 = vsub.f32 %v585_v30, %v623_v0  ;;  %v631_v2 = vsub.f32 %v586_v26, %v623_v0 }
 0x32a   :  { %v1047_v8 = vpop.eup %1046  ;;  %v666_v9 = vsel %vm587_vm4, %v1045_v5, 0.0 }
 0x32b   :  { %v667_v10 = vsel %vm587_vm4, %v1047_v8, 0.0  ;;  %v644_v11 = vmul.f32 1.442695, %v630_v1  ;;  %v646_v12 = vmul.f32 1.442695, %v631_v2 }
 0x32c   :  { %v668_v47 = vadd.f32 %v667_v10, %v666_v9 }
 0x32d   :  { %1050 = vpow2.f32 %v644_v11 }
 0x32e   :  { %v1049_v39 = vpop.eup %1048  ;;  %v669_v13 = vrot.slane %v668_v47, 4  ;;  %1052 = vpow2.f32 %v646_v12 }
 0x32f   :  { %v690_v15 = vmul.f32 %v1049_v39, %v1039_v14  ;;  %v691_v19 = vmul.f32 %v1049_v39, %v1041_v17 }
 0x330   :  { %v670_v16 = vadd.f32 %v669_v13, %v668_v47 }
 0x331   :  { %708 = vperm.xlu1 %1017, %v690_v15  }
 0x332   :  { %v671_v18 = vrot.slane %v670_v16, 2 }
 0x334   :  { %v672_v20 = vadd.f32 %v671_v18, %v670_v16 }
 0x335   :  { %713 = vperm.xlu1 %1017, %v691_v19  }
 0x336   :  { %v673_v21 = vrot.slane %v672_v20, 1 }
 0x337   :  { %v1051_v22 = vpop.eup %1050 }
 0x338   :  { %v1053_v23 = vpop.eup %1052  ;;  %v675_v24 = vsel %vm587_vm4, %v1051_v22, 0.0  ;;  %v674_v25 = vadd.f32 %v673_v21, %v672_v20 }
 0x339   :  { %v676_v26 = vsel %vm587_vm4, %v1053_v23, 0.0 }
 0x33a   :  { %v677_v27 = vadd.f32 %v676_v26, %v675_v24  ;;  %1054 = vrcp.f32 %v674_v25 }
 0x33c   :  { %v678_v28 = vrot.slane %v677_v27, 4 }
 0x33e   :  { %v679_v29 = vadd.f32 %v678_v28, %v677_v27 }
 0x340   :  { %v680_v30 = vrot.slane %v679_v29, 2 }
 0x342   :  { %v681_v14 = vadd.f32 %v680_v30, %v679_v29 }
 0x344   :  { %v1055_v31 = vpop.eup %1054  ;;  %v682_v32 = vrot.slane %v681_v14, 1 }
 0x345   :  { %v693_v33 = vmul.f32 %v1055_v31, %v1047_v8  ;;  %v692_v17 = vmul.f32 %v1055_v31, %v1045_v5 }
 0x346   :  { %v683_v34 = vadd.f32 %v682_v32, %v681_v14 }
 0x347   :  { %723 = vperm.xlu1 %1017, %v693_v33   ;;  %718 = vperm.xlu0 %1013, %v692_v17  }
 0x348   :  { %1056 = vrcp.f32 %v683_v34 }
 0x352   :  { %v1057_v36 = vpop.eup %1056 }
 0x353   :  { %v695_v37 = vmul.f32 %v1057_v36, %v1053_v23  ;;  %v694_v41 = vmul.f32 %v1057_v36, %v1051_v22 }
 0x355   :  { %733 = vperm.xlu1 %1017, %v695_v37   ;;  %728 = vperm.xlu0 %1013, %v694_v41  }
 0x3a2   :  { %v699_v42 = vpop.permute.xlu1 %698  ;;  %v704_v49 = vpop.permute.xlu0 %703 }
 0x3a3   :  { %v736_v53 = vmul.f32 %v699_v42, %v366_v38  ;;  %v737_v54 = vmul.f32 %v704_v49, %v367_v43 }
 0x3a5   :  { %v744_v61 = vsel %vm385_vm6, %v736_v53, 0.0  ;;  %v745_v0 = vsel %vm385_vm6, %v737_v54, 0.0 }
 0x3b0   :  { %v709_v44 = vpop.permute.xlu1 %708 }
 0x3b1   :  { %v738_v57 = vmul.f32 %v709_v44, %v368_v46  ;;  %v746_v46 = vadd.f32 %v745_v0, %v744_v61 }
 0x3b3   :  { %v753_v50 = vsel %vm385_vm6, %v738_v57, 0.0  ;;  %v747_v2 = vrot.slane %v746_v46, 4 }
 0x3b4   :  { %v714_v48 = vpop.permute.xlu1 %713 }
 0x3b5   :  { %v739_v52 = vmul.f32 %v714_v48, %v369_v51  ;;  %v748_v10 = vadd.f32 %v747_v2, %v746_v46 }
 0x3b7   :  { %v754_v58 = vsel %vm385_vm6, %v739_v52, 0.0  ;;  %v749_v47 = vrot.slane %v748_v10, 2 }
 0x3b8   :  { %v755_v40 = vadd.f32 %v754_v58, %v753_v50 }
 0x3b9   :  { %v750_v19 = vadd.f32 %v749_v47, %v748_v10 }
 0x3ba   :  { %v756_v5 = vrot.slane %v755_v40, 4 }
 0x3bb   :  { %v751_v24 = vrot.slane %v750_v19, 1 }
 0x3bc   :  { %v757_v8 = vadd.f32 %v756_v5, %v755_v40 }
 0x3bd   :  { %v752_v3 = vadd.f32 %v751_v24, %v750_v19 }
 0x3be   :  { %v758_v11 = vrot.slane %v757_v8, 2 }
 0x3c0   :  { %v759_v15 = vadd.f32 %v758_v11, %v757_v8 }
 0x3c2   :  { %v760_v21 = vrot.slane %v759_v15, 1 }
 0x3c4   :  { %v761_v6 = vadd.f32 %v760_v21, %v759_v15 }
 0x3c6   :  { %v724_v62 = vpop.permute.xlu1 %723  ;;  %v719_v59 = vpop.permute.xlu0 %718  ;;  %v785_v28 = vsel %vm784_vm14, %v761_v6, %v752_v3 }
 0x3c7   :  { %v741_v35 = vmul.f32 %v724_v62, %v371_v63  ;;  %v740_v38 = vmul.f32 %v719_v59, %v370_v56 }
 0x3c9   :  { %v763_v43 = vsel %vm385_vm6, %v741_v35, 0.0  ;;  %v762_v45 = vsel %vm385_vm6, %v740_v38, 0.0 }
 0x3ca   :  { %v764_v51 = vadd.f32 %v763_v43, %v762_v45 }
 0x3cc   :  { %v765_v1 = vrot.slane %v764_v51, 4 }
 0x3ce   :  { %v766_v9 = vadd.f32 %v765_v1, %v764_v51 }
 0x3d0   :  { %v767_v63 = vrot.slane %v766_v9, 2 }
 0x3d2   :  { %v768_v18 = vadd.f32 %v767_v63, %v766_v9 }
 0x3d4   :  { %v734_v12 = vpop.permute.xlu1 %733  ;;  %v729_v60 = vpop.permute.xlu0 %728  ;;  %v769_v23 = vrot.slane %v768_v18, 1 }
 0x3d5   :  { %v743_v55 = vmul.f32 %v734_v12, %v373_v7  ;;  %v742_v56 = vmul.f32 %v729_v60, %v372_v4 }
 0x3d6   :  { %v770_v26 = vadd.f32 %v769_v23, %v768_v18 }
 0x3d7   :  { %v772_v39 = vsel %vm385_vm6, %v743_v55, 0.0  ;;  %v771_v13 = vsel %vm385_vm6, %v742_v56, 0.0 }
 0x3d8   :  { %v773_v16 = vadd.f32 %v772_v39, %v771_v13  ;;  %v787_v29 = vsel %vm786_vm7, %v770_v26, %v785_v28 }
 0x3da   :  { %v774_v20 = vrot.slane %v773_v16, 4 }
 0x3dc   :  { %v775_v22 = vadd.f32 %v774_v20, %v773_v16 }
 0x3de   :  { %v776_v25 = vrot.slane %v775_v22, 2 }
 0x3e0   :  { %v777_v7 = vadd.f32 %v776_v25, %v775_v22 }
 0x3e2   :  { %v778_v4 = vrot.slane %v777_v7, 1 }
 0x3e4   :  { %v779_v27 = vadd.f32 %v778_v4, %v777_v7 }
 0x3e6   :  { %v789_v30 = vsel %vm788_vm11, %v779_v27, %v787_v29 }
 0x3e7   :  { %792 = vst.msk [vmem:[#allocation2] sm:$0xf] %vm791_vm0, %v789_v30 }
 0x3e8   :  { %1069 = shalt.err (!%p1066_p4)
}
 0x3e9   :  { %s1070_s15 = scalar_lea.hbm %s1511_s7, 64 }
 0x3ea   :  { %p1071_p5 = scmp.ne.s32.totalorder %s1511_s7, %s1070_s15  ;;  %p1074_p6 = scmp.lt.u32.totalorder %s1070_s15, %s1511_s7 }
 0x3ec   :  { %p1076_p7 = pnand %p1074_p6, %p1071_p5 }
 0x3ee   :  { %1079 = shalt.err (!%p1076_p7)
}
 0x3ef   :  { %802 = dma.vmem_to_hbm [thread:$0]  %s800_s2, 64, %s1511_s7, [#allocation3]  }
 0x3f0   :  { %1080 = dma.done.wait [#allocation3], 64  }
 0x3f1   :  { %1081 = vsyncadd [#allocation3], 4294967232 }
 0x3f2   :  { %806 = vsyncpa [#allocation3], 1 }

</bundles_post_ra>
